<compile_context>
chip_gen: v7x
topology: tpu7x:2x2x1
jax: 0.10.0
libtpu: 0.0.40
codegen_flags: <defaults>
</compile_context>

<pallas_src>
import functools

import jax
import jax.numpy as jnp
from jax.experimental import pallas as pl
from jax.experimental.pallas import tpu as pltpu

EPS = 1e-5
LANE = 128     # lane alignment for hidden feature dims
SUBLANE = 16   # bf16 sublane pack for the layer-1 contraction dim


def _round_up(n, m):
    return ((n + m - 1) // m) * m


def _bn_tanh(h, gamma, beta):
    # Training-mode BatchNorm1d (biased variance) as scale/shift, then Tanh:
    #   scale = gamma * rsqrt(var + eps);  shift = beta - mean * scale
    mean = jnp.mean(h, axis=0, keepdims=True)
    d = h - mean
    var = jnp.mean(d * d, axis=0, keepdims=True)
    scale = gamma * jax.lax.rsqrt(var + EPS)
    shift = beta - mean * scale
    return jnp.tanh(h * scale + shift)


def generator_kernel(xl_ref, w1_ref, w2_ref, w3_ref, vec_ref, out_ref,
                     *, h1p, h2p, out_dim):
    # Packed per-feature vectors (rows of the (8, W) f32 slab).
    g1, be1 = vec_ref[0:1, :h1p], vec_ref[1:2, :h1p]
    g2, be2 = vec_ref[2:3, :h2p], vec_ref[3:4, :h2p]
    b3 = vec_ref[4:5, :out_dim]

    # Block 1: fused Linear([x, label]) -> BN -> Tanh.
    # Linear bias b1 omitted: cancelled exactly by BN's mean subtraction.
    h1 = jnp.dot(xl_ref[...], w1_ref[...], preferred_element_type=jnp.float32)
    h1 = _bn_tanh(h1, g1, be1)

    # Block 2: Linear -> BN -> Tanh (bias b2 likewise omitted).
    h2 = jnp.dot(h1.astype(w2_ref.dtype), w2_ref[...],
                 preferred_element_type=jnp.float32)
    h2 = _bn_tanh(h2, g2, be2)

    # Output layer: plain Linear, stored unpadded as (B, OUT).
    out = jnp.dot(h2.astype(w3_ref.dtype), w3_ref[...],
                  preferred_element_type=jnp.float32) + b3
    out_ref[...] = out.astype(out_ref.dtype)


def cgan_generator_forward(label, x, params):
    """label: (B, label_size) f32, x: (B, latent) f32 -> (B, gan_dim_output) f32."""
    B = x.shape[0]
    K1 = x.shape[1] + label.shape[1]
    H1 = params["w1"].shape[1]
    H2 = params["w2"].shape[1]
    OUT = params["w3"].shape[1]
    K1p = _round_up(K1, SUBLANE)
    H1p, H2p = _round_up(H1, LANE), _round_up(H2, LANE)
    W = max(H1p, H2p, OUT)

    # torch.cat((x, label), dim=1) folded into the wrapper -> one fused layer-1 matmul.
    xl = jnp.concatenate([x, label], axis=1)
    xl = jnp.pad(xl, ((0, 0), (0, K1p - K1))).astype(jnp.bfloat16)

    # Zero-pad hidden dims to lane multiples (K1 to a sublane multiple); cast to bf16
    # for native MXU passes.  The output feature dim stays unpadded.
    w1 = jnp.pad(params["w1"], ((0, K1p - K1), (0, H1p - H1))).astype(jnp.bfloat16)
    w2 = jnp.pad(params["w2"], ((0, H1p - H1), (0, H2p - H2))).astype(jnp.bfloat16)
    w3 = jnp.pad(params["w3"], ((0, H2p - H2), (0, 0))).astype(jnp.bfloat16)

    def row(v):
        v = v.reshape(1, -1).astype(jnp.float32)
        return jnp.pad(v, ((0, 0), (0, W - v.shape[1])))

    # One (8, W) f32 slab: rows = g1, be1, g2, be2, b3, <zeros>.
    # ZERO-padding of gamma keeps padded feature lanes exactly 0 through BN+tanh.
    vec = jnp.concatenate(
        [row(params["g1"]), row(params["be1"]),
         row(params["g2"]), row(params["be2"]),
         row(params["b3"]), jnp.zeros((3, W), jnp.float32)],
        axis=0,
    )

    # Advisory cost + VMEM budget hints.
    flops = 2 * B * (K1p * H1p + H1p * H2p + H2p * OUT)
    bytes_accessed = ((xl.size + w1.size + w2.size + w3.size) * 2
                      + vec.size * 4 + B * OUT * 4)
    transcendentals = B * (H1p + H2p) + H1p + H2p          # tanh + rsqrt
    resident = bytes_accessed + 4 * B * (H1p + H2p) * 4    # + f32 activations
    vmem_limit = int(min(48 * 1024 * 1024, max(8 * 1024 * 1024, 4 * resident)))

    vmem = pl.BlockSpec(memory_space=pltpu.MemorySpace.VMEM)
    return pl.pallas_call(
        functools.partial(generator_kernel, h1p=H1p, h2p=H2p, out_dim=OUT),
        out_shape=jax.ShapeDtypeStruct((B, OUT), jnp.float32),
        in_specs=[vmem] * 5,
        out_specs=vmem,
        cost_estimate=pl.CostEstimate(flops=int(flops),
                                      transcendentals=int(transcendentals),
                                      bytes_accessed=int(bytes_accessed)),
        compiler_params=pltpu.CompilerParams(vmem_limit_bytes=vmem_limit),
    )(xl, w1, w2, w3, vec)


def init_params(key, latent, label_size, h1, h2, out_dim):
    """Deterministic init mimicking nn.Linear default (uniform +-1/sqrt(fan_in))."""
    def linear(key, fan_in, fan_out):
        kw, kb = jax.random.split(key)
        bound = 1.0 / jnp.sqrt(fan_in)
        w = jax.random.uniform(kw, (fan_in, fan_out), jnp.float32, -bound, bound)
        b = jax.random.uniform(kb, (fan_out,), jnp.float32, -bound, bound)
        return w, b

    k1, k2, k3 = jax.random.split(key, 3)
    w1, b1 = linear(k1, latent + label_size, h1)   # concat order is (x, label)
    w2, b2 = linear(k2, h1, h2)
    w3, b3 = linear(k3, h2, out_dim)
    return {
        "w1": w1, "b1": b1,
        "g1": jnp.ones((h1,), jnp.float32), "be1": jnp.zeros((h1,), jnp.float32),
        "w2": w2, "b2": b2,
        "g2": jnp.ones((h2,), jnp.float32), "be2": jnp.zeros((h2,), jnp.float32),
        "w3": w3, "b3": b3,
    }


def _reference_f32(label, x, p):
    """Pure-f32 JAX reference matching the PyTorch module exactly (incl. b1/b2)."""
    h = jnp.concatenate([x, label], axis=1)
    h = h @ p["w1"] + p["b1"]
    m, v = jnp.mean(h, 0, keepdims=True), jnp.var(h, 0, keepdims=True)
    h = jnp.tanh((h - m) / jnp.sqrt(v + EPS) * p["g1"] + p["be1"])
    h = h @ p["w2"] + p["b2"]
    m, v = jnp.mean(h, 0, keepdims=True), jnp.var(h, 0, keepdims=True)
    h = jnp.tanh((h - m) / jnp.sqrt(v + EPS) * p["g2"] + p["be2"])
    return h @ p["w3"] + p["b3"]


def _reference_bf16(label, x, p):
    """Reference reproducing the kernel's numerics (bf16 matmul operands, f32 BN)."""
    def mm(a, w):
        return jnp.dot(a.astype(jnp.bfloat16), w.astype(jnp.bfloat16),
                       preferred_element_type=jnp.float32)
    h = jnp.concatenate([x, label], axis=1)
    h = _bn_tanh(mm(h, p["w1"]), p["g1"], p["be1"])   # b1/b2 cancelled by BN
    h = _bn_tanh(mm(h, p["w2"]), p["g2"], p["be2"])
    return mm(h, p["w3"]) + p["b3"]


if __name__ == "__main__":
    # Small synthetic config consistent with the module's __init__.
    B = 8                  # batch
    LATENT = 16            # param.gan_dim_latent
    LABEL = 4              # param.label_size
    H1, H2 = 32, 32        # gan_dim_hidden_1 / gan_dim_hidden_2
    OUT = 16               # gan_dim_output

    key = jax.random.PRNGKey(0)
    kx, kl, kp = jax.random.split(key, 3)
    x = jax.random.normal(kx, (B, LATENT), jnp.float32)
    label = jax.random.normal(kl, (B, LABEL), jnp.float32)
    params = init_params(kp, LATENT, LABEL, H1, H2, OUT)

    out = cgan_generator_forward(label, x, params)
    out = jax.block_until_ready(out)
    assert out.shape == (B, OUT)

    # Tight check vs a reference that mirrors the kernel's bf16-matmul numerics.
    ref_bf16 = _reference_bf16(label, x, params)
    assert jnp.allclose(out, ref_bf16, atol=2e-3, rtol=2e-3), "mismatch vs bf16 reference"

    # Looser sanity check vs the exact f32 module semantics (bf16 operands drift).
    ref_f32 = _reference_f32(label, x, params)
    assert jnp.allclose(out, ref_f32, atol=5e-2, rtol=5e-2), "mismatch vs f32 reference"

    print("KERNEL_OK")
</pallas_src>

<mosaic_0001>
module attributes {stable_mosaic.version = 11 : i64} {
  func.func @generator_kernel(%arg0: memref<8x32xbf16, #tpu.memory_space<vmem>>, %arg1: memref<32x128xbf16, #tpu.memory_space<vmem>>, %arg2: memref<128x128xbf16, #tpu.memory_space<vmem>>, %arg3: memref<128x16xbf16, #tpu.memory_space<vmem>>, %arg4: memref<8x128xf32, #tpu.memory_space<vmem>>, %arg5: memref<8x16xf32, #tpu.memory_space<vmem>>) attributes {dimension_semantics = [], scalar_prefetch = 0 : i64, scratch_operands = 0 : i64, tpu.core_type = #tpu.core_type<tc>} {
    %c0 = arith.constant 0 : index
    %c0_0 = arith.constant 0 : index
    %0 = vector.load %arg4[%c0, %c0_0] : memref<8x128xf32, #tpu.memory_space<vmem>>, vector<1x128xf32>
    %c1 = arith.constant 1 : index
    %c0_1 = arith.constant 0 : index
    %1 = vector.load %arg4[%c1, %c0_1] : memref<8x128xf32, #tpu.memory_space<vmem>>, vector<1x128xf32>
    %c2 = arith.constant 2 : index
    %c0_2 = arith.constant 0 : index
    %2 = vector.load %arg4[%c2, %c0_2] : memref<8x128xf32, #tpu.memory_space<vmem>>, vector<1x128xf32>
    %c3 = arith.constant 3 : index
    %c0_3 = arith.constant 0 : index
    %3 = vector.load %arg4[%c3, %c0_3] : memref<8x128xf32, #tpu.memory_space<vmem>>, vector<1x128xf32>
    %c4 = arith.constant 4 : index
    %c0_4 = arith.constant 0 : index
    %4 = vector.load %arg4[%c4, %c0_4] : memref<8x128xf32, #tpu.memory_space<vmem>>, vector<1x16xf32>
    %c0_5 = arith.constant 0 : index
    %c0_6 = arith.constant 0 : index
    %5 = vector.load %arg0[%c0_5, %c0_6] : memref<8x32xbf16, #tpu.memory_space<vmem>>, vector<8x32xbf16>
    %c0_7 = arith.constant 0 : index
    %c0_8 = arith.constant 0 : index
    %6 = vector.load %arg1[%c0_7, %c0_8] : memref<32x128xbf16, #tpu.memory_space<vmem>>, vector<32x128xbf16>
    %cst = arith.constant dense<0.000000e+00> : vector<8x128xf32>
    %7 = tpu.matmul %5, %6, %cst {dimension_numbers = #tpu.dot_dimension_numbers<[1], [0], [0], [1], [0, 0, 1, 1], [], []>} : vector<8x32xbf16>, vector<32x128xbf16>, vector<8x128xf32> -> vector<8x128xf32>
    %cst_9 = arith.constant dense<0.000000e+00> : vector<128xf32>
    %8 = vector.multi_reduction <add>, %7, %cst_9 [0] : vector<8x128xf32> to vector<128xf32>
    %9 = vector.shape_cast %8 : vector<128xf32> to vector<1x128xf32>
    %cst_10 = arith.constant 8.000000e+00 : f32
    %10 = vector.broadcast %cst_10 : f32 to vector<1x128xf32>
    %11 = arith.divf %9, %10 : vector<1x128xf32>
    %12 = vector.broadcast %11 : vector<1x128xf32> to vector<8x128xf32>
    %13 = arith.subf %7, %12 : vector<8x128xf32>
    %14 = arith.mulf %13, %13 : vector<8x128xf32>
    %cst_11 = arith.constant dense<0.000000e+00> : vector<128xf32>
    %15 = vector.multi_reduction <add>, %14, %cst_11 [0] : vector<8x128xf32> to vector<128xf32>
    %16 = vector.shape_cast %15 : vector<128xf32> to vector<1x128xf32>
    %cst_12 = arith.constant 8.000000e+00 : f32
    %17 = vector.broadcast %cst_12 : f32 to vector<1x128xf32>
    %18 = arith.divf %16, %17 : vector<1x128xf32>
    %cst_13 = arith.constant 9.99999974E-6 : f32
    %19 = vector.broadcast %cst_13 : f32 to vector<1x128xf32>
    %20 = arith.addf %18, %19 : vector<1x128xf32>
    %21 = math.rsqrt %20 : vector<1x128xf32>
    %22 = arith.mulf %0, %21 : vector<1x128xf32>
    %23 = arith.mulf %11, %22 : vector<1x128xf32>
    %24 = arith.subf %1, %23 : vector<1x128xf32>
    %25 = vector.broadcast %22 : vector<1x128xf32> to vector<8x128xf32>
    %26 = arith.mulf %7, %25 : vector<8x128xf32>
    %27 = vector.broadcast %24 : vector<1x128xf32> to vector<8x128xf32>
    %28 = arith.addf %26, %27 : vector<8x128xf32>
    %29 = math.tanh %28 : vector<8x128xf32>
    %30 = arith.truncf %29 : vector<8x128xf32> to vector<8x128xbf16>
    %c0_14 = arith.constant 0 : index
    %c0_15 = arith.constant 0 : index
    %31 = vector.load %arg2[%c0_14, %c0_15] : memref<128x128xbf16, #tpu.memory_space<vmem>>, vector<128x128xbf16>
    %cst_16 = arith.constant dense<0.000000e+00> : vector<8x128xf32>
    %32 = tpu.matmul %30, %31, %cst_16 {dimension_numbers = #tpu.dot_dimension_numbers<[1], [0], [0], [1], [0, 0, 1, 1], [], []>} : vector<8x128xbf16>, vector<128x128xbf16>, vector<8x128xf32> -> vector<8x128xf32>
    %cst_17 = arith.constant dense<0.000000e+00> : vector<128xf32>
    %33 = vector.multi_reduction <add>, %32, %cst_17 [0] : vector<8x128xf32> to vector<128xf32>
    %34 = vector.shape_cast %33 : vector<128xf32> to vector<1x128xf32>
    %cst_18 = arith.constant 8.000000e+00 : f32
    %35 = vector.broadcast %cst_18 : f32 to vector<1x128xf32>
    %36 = arith.divf %34, %35 : vector<1x128xf32>
    %37 = vector.broadcast %36 : vector<1x128xf32> to vector<8x128xf32>
    %38 = arith.subf %32, %37 : vector<8x128xf32>
    %39 = arith.mulf %38, %38 : vector<8x128xf32>
    %cst_19 = arith.constant dense<0.000000e+00> : vector<128xf32>
    %40 = vector.multi_reduction <add>, %39, %cst_19 [0] : vector<8x128xf32> to vector<128xf32>
    %41 = vector.shape_cast %40 : vector<128xf32> to vector<1x128xf32>
    %cst_20 = arith.constant 8.000000e+00 : f32
    %42 = vector.broadcast %cst_20 : f32 to vector<1x128xf32>
    %43 = arith.divf %41, %42 : vector<1x128xf32>
    %cst_21 = arith.constant 9.99999974E-6 : f32
    %44 = vector.broadcast %cst_21 : f32 to vector<1x128xf32>
    %45 = arith.addf %43, %44 : vector<1x128xf32>
    %46 = math.rsqrt %45 : vector<1x128xf32>
    %47 = arith.mulf %2, %46 : vector<1x128xf32>
    %48 = arith.mulf %36, %47 : vector<1x128xf32>
    %49 = arith.subf %3, %48 : vector<1x128xf32>
    %50 = vector.broadcast %47 : vector<1x128xf32> to vector<8x128xf32>
    %51 = arith.mulf %32, %50 : vector<8x128xf32>
    %52 = vector.broadcast %49 : vector<1x128xf32> to vector<8x128xf32>
    %53 = arith.addf %51, %52 : vector<8x128xf32>
    %54 = math.tanh %53 : vector<8x128xf32>
    %55 = arith.truncf %54 : vector<8x128xf32> to vector<8x128xbf16>
    %c0_22 = arith.constant 0 : index
    %c0_23 = arith.constant 0 : index
    %56 = vector.load %arg3[%c0_22, %c0_23] : memref<128x16xbf16, #tpu.memory_space<vmem>>, vector<128x16xbf16>
    %cst_24 = arith.constant dense<0.000000e+00> : vector<8x16xf32>
    %57 = tpu.matmul %55, %56, %cst_24 {dimension_numbers = #tpu.dot_dimension_numbers<[1], [0], [0], [1], [0, 0, 1, 1], [], []>} : vector<8x128xbf16>, vector<128x16xbf16>, vector<8x16xf32> -> vector<8x16xf32>
    %58 = vector.broadcast %4 : vector<1x16xf32> to vector<8x16xf32>
    %59 = arith.addf %57, %58 : vector<8x16xf32>
    %c0_25 = arith.constant 0 : index
    %c0_26 = arith.constant 0 : index
    %60 = vector.load %arg5[%c0_25, %c0_26] : memref<8x16xf32, #tpu.memory_space<vmem>>, vector<8x16xf32>
    tpu.vector_store %arg5[%c0_25, %c0_26], %59 {strides = array<i32>} : memref<8x16xf32, #tpu.memory_space<vmem>>, vector<8x16xf32>,
    return
  }
}

</mosaic_0001>

<bundles_post_ra>
// kernel: tpu_custom_call.1
= control target key start
LH: loop header
LB: loop body
LE: loop exit
PB: predicated region body
PF: predicated region fallthrough
CT: control target
= control target key end

     0   :  { %10 = vsyncpa [#allocation3], 0  ;;  %s775_s0 = inlined_call_operand.hbm [shape: bf16[8,32], index: 0, kind: input, shape index: {}]   ;;  %s776_s1 = inlined_call_operand.hbm [shape: bf16[32,128], index: 1, kind: input, shape index: {}]   ;;  %s777_s2 = inlined_call_operand.vmem [shape: bf16[128,128], index: 2, kind: input, shape index: {}]   ;;  %s778_s3 = inlined_call_operand.vmem [shape: bf16[128,16], index: 3, kind: input, shape index: {}]   ;;  %s779_s4 = inlined_call_operand.vmem [shape: f32[8,128], index: 4, kind: input, shape index: {}]   ;;  %s780_s5 = inlined_call_operand.hbm [shape: f32[8,16], index: 5, kind: output, shape index: {}]  }
   0x1   :  { %11 = vsyncpa [#allocation6], 0 }
   0x2   :  { %12 = vsyncpa [#allocation4], 0  ;;  %s605_s18 = smov [#allocation2]   ;;  %s606_s20 = smov [#allocation5]  }
   0x3   :  { %s19_s19 = sshll.u32 %s605_s18, 4  ;;  %s28_s21 = sshll.u32 %s606_s20, 4  ;;  %s20_s19 = int_to_ptr.vmem [resolvable:$true] %s19_s19  ;;  %s642_s21 = int_to_ptr.vmem [resolvable:$true] %s28_s21 }
   0x4   :  { %s533_s24 = scalar_lea.hbm %s775_s0, 64 }
   0x5   :  { %p534_p0 = scmp.ne.s32.totalorder %s775_s0, %s533_s24  ;;  %p537_p1 = scmp.lt.u32.totalorder %s533_s24, %s775_s0 }
   0x7   :  { %p539_p2 = pnand %p537_p1, %p534_p0 }
   0x9   :  { %542 = shalt.err (!%p539_p2)
}
   0xa   :  { %s543_s29 = scalar_lea.vmem %s20_s19, 64  ;;  %p548_p4 = scmp.lt.s32.totalorder %s20_s19, %s20_s19 }
   0xb   :  { %p544_p3 = scmp.ne.s32.totalorder %s20_s19, %s543_s29  ;;  %p549_p5 = scmp.lt.s32.totalorder %s543_s29, %s543_s29 }
   0xd   :  { %p550_p6 = por %p549_p5, %p548_p4 }
   0xf   :  { %p551_p7 = pnand %p550_p6, %p544_p3 }
  0x11   :  { %554 = shalt.err (!%p551_p7)
}
  0x12   :  { %22 = dma.hbm_to_vmem [thread:$0]  %s775_s0, 64, %s20_s19, [#allocation3]  }
  0x13   :  { %s555_s9 = scalar_lea.hbm %s776_s1, 256 }
  0x14   :  { %p556_p8 = scmp.ne.s32.totalorder %s776_s1, %s555_s9  ;;  %p559_p9 = scmp.lt.u32.totalorder %s555_s9, %s776_s1 }
  0x16   :  { %p561_p10 = pnand %p559_p9, %p556_p8 }
  0x18   :  { %564 = shalt.err (!%p561_p10)
}
  0x19   :  { %s565_s14 = scalar_lea.vmem %s642_s21, 256  ;;  %p570_p12 = scmp.lt.s32.totalorder %s642_s21, %s642_s21 }
  0x1a   :  { %p566_p11 = scmp.ne.s32.totalorder %s642_s21, %s565_s14  ;;  %p571_p13 = scmp.lt.s32.totalorder %s565_s14, %s565_s14 }
  0x1c   :  { %p572_p0 = por %p571_p13, %p570_p12 }
  0x1e   :  { %p573_p1 = pnand %p572_p0, %p566_p11 }
  0x20   :  { %576 = shalt.err (!%p573_p1)
}
  0x21   :  { %s607_s0 = smov 64   ;;  %s608_s15 = smov 4  }
  0x22   :  { %34 = dma.hbm_to_vmem [thread:$0]  %s776_s1, 256, %s642_s21, [#allocation6], %s607_s0, %s607_s0, %s608_s15  }
  0x23   :  { %599 = dma.done.wait [#allocation3], 64  }
  0x24   :  { %600 = vsyncadd [#allocation3], 4294967232 }
  0x25   :  { %601 = dma.done.wait [#allocation6], 256  }
  0x26   :  { %602 = vsyncadd [#allocation6], 4294967040  ;;  %v609_v0 = vmov 0.0   ;;  %vm610_vm0 = vmmov 0   ;;  %v507_v1 = vld [vmem:[#allocation5] sm:$0xff]   ;;  %v508_v2 = vld [vmem:[#allocation5 + $0x8] sm:$0xff]   ;;  %v136_v33 = vlaneseq }
  0x27   :  { %452 = vmatprep.subr.bf16.mxu0 %v609_v0  ;;  %456 = vmatprep.mubr.msk.bf16.mxu0 %vm610_vm0, %v609_v0  ;;  %vm70_vm1 = vcmask 261120   ;;  %v53_v3 = vld [vmem:[#allocation2] sm:$0xf]  ;;  %v510_v5 = vld [vmem:[%s777_s2 + $0x8] sm:$0xff]   ;;  %v511_v6 = vld [vmem:[%s777_s2 + $0x10] sm:$0xff]   ;;  %s611_s30 = smov [#allocation7]  }
  0x28   :  { %460 = vmatprep.subr.bf16.mxu1 %v609_v0  ;;  %476 = vmatprep.mubr.msk.bf16.mxu1 %vm610_vm0, %v609_v0  ;;  %v509_v4 = vld [vmem:[%s777_s2] sm:$0xff]   ;;  %v512_v7 = vld [vmem:[%s777_s2 + $0x18] sm:$0xff]   ;;  %v514_v9 = vld [vmem:[%s777_s2 + $0x28] sm:$0xff]   ;;  %v137_v34 = vshrl.u32 %v136_v33, 7  ;;  %s401_s6 = sshll.u32 %s611_s30, 4  ;;  %vm393_vm2 = vcmask 130048   ;;  %s402_s6 = int_to_ptr.vmem [resolvable:$true] %s401_s6 }
  0x29   :  { %453 = vmatpush3.bf16.msra.mxu0 %v507_v1  ;;  %461 = vmatpush3.bf16.msra.mxu1 %v509_v4  ;;  %v513_v8 = vld [vmem:[%s777_s2 + $0x20] sm:$0xff]   ;;  %v515_v10 = vld [vmem:[%s777_s2 + $0x30] sm:$0xff]   ;;  %v516_v11 = vld [vmem:[%s777_s2 + $0x38] sm:$0xff]   ;;  %s577_s7 = scalar_lea.vmem %s402_s6, 128  ;;  %p582_p3 = scmp.lt.s32.totalorder %s402_s6, %s402_s6 }
  0x2a   :  { %454 = vmatprep.subr.bf16.mxu0 %v609_v0  ;;  %462 = vmatprep.subr.bf16.mxu1 %v609_v0  ;;  %v48_v35 = vld [vmem:[%s779_s4] sm:$0x1]  ;;  %v714_v36 = vsub.s32 0, %v137_v34  ;;  %v49_v39 = vld [vmem:[%s779_s4 + $0x1] sm:$0x1]  ;;  %v518_v49 = vld [vmem:[%s778_s3 + $0x8] sm:$0xff]   ;;  %p578_p2 = scmp.ne.s32.totalorder %s402_s6, %s577_s7  ;;  %p583_p4 = scmp.lt.s32.totalorder %s577_s7, %s577_s7 }
  0x2b   :  { %v517_v48 = vld [vmem:[%s778_s3] sm:$0xff]   ;;  %v519_v50 = vld [vmem:[%s778_s3 + $0x10] sm:$0xff]   ;;  %v520_v51 = vld [vmem:[%s778_s3 + $0x18] sm:$0xff]  }
  0x2c   :  { %v521_v52 = vld [vmem:[%s778_s3 + $0x20] sm:$0xff]   ;;  %v522_v53 = vld [vmem:[%s778_s3 + $0x28] sm:$0xff]   ;;  %v523_v54 = vld [vmem:[%s778_s3 + $0x30] sm:$0xff]   ;;  %p584_p5 = por %p583_p4, %p582_p3 }
  0x2d   :  { %455 = vmatpush3.bf16.msra.mxu0 %v508_v2  ;;  %463 = vmatpush3.bf16.msra.mxu1 %v510_v5  ;;  %v524_v55 = vld [vmem:[%s778_s3 + $0x38] sm:$0xff]  }
  0x2e   :  { %480 = vmatprep.subr.bf16.mxu0 %v609_v0  ;;  %464 = vmatprep.subr.bf16.mxu1 %v609_v0  ;;  %p585_p6 = pnand %p584_p5, %p578_p2 }
  0x30   :  { %457 = vmatmul.mubr.msk.bf16.vlgmr.msra.gmra.mrb[0].mxu0 %vm70_vm1, %v53_v3 }
  0x31   :  { %496 = vmatprep.mubr.msk.bf16.mxu0 %vm610_vm0, %v609_v0  ;;  %465 = vmatpush3.bf16.msra.mxu1 %v511_v6 }
  0x32   :  { %466 = vmatprep.subr.bf16.mxu1 %v609_v0  ;;  %481 = vmatpush3.bf16.msra.mxu0 %v517_v48 }
  0x33   :  { %482 = vmatprep.subr.bf16.mxu0 %v609_v0 }
  0x35   :  { %467 = vmatpush3.bf16.msra.mxu1 %v512_v7 }
  0x36   :  { %468 = vmatprep.subr.bf16.mxu1 %v609_v0  ;;  %483 = vmatpush3.bf16.msra.mxu0 %v518_v49 }
  0x37   :  { %484 = vmatprep.subr.bf16.mxu0 %v609_v0 }
  0x39   :  { %469 = vmatpush3.bf16.msra.mxu1 %v513_v8 }
  0x3a   :  { %470 = vmatprep.subr.bf16.mxu1 %v609_v0  ;;  %485 = vmatpush3.bf16.msra.mxu0 %v519_v50 }
  0x3b   :  { %486 = vmatprep.subr.bf16.mxu0 %v609_v0 }
  0x3d   :  { %471 = vmatpush3.bf16.msra.mxu1 %v514_v9 }
  0x3e   :  { %472 = vmatprep.subr.bf16.mxu1 %v609_v0  ;;  %487 = vmatpush3.bf16.msra.mxu0 %v520_v51 }
  0x3f   :  { %488 = vmatprep.subr.bf16.mxu0 %v609_v0 }
  0x41   :  { %473 = vmatpush3.bf16.msra.mxu1 %v515_v10 }
  0x42   :  { %474 = vmatprep.subr.bf16.mxu1 %v609_v0  ;;  %489 = vmatpush3.bf16.msra.mxu0 %v521_v52 }
  0x43   :  { %490 = vmatprep.subr.bf16.mxu0 %v609_v0 }
  0x45   :  { %475 = vmatpush3.bf16.msra.mxu1 %v516_v11 }
  0x46   :  { %491 = vmatpush3.bf16.msra.mxu0 %v522_v53 }
  0x47   :  { %492 = vmatprep.subr.bf16.mxu0 %v609_v0 }
  0x4a   :  { %493 = vmatpush3.bf16.msra.mxu0 %v523_v54 }
  0x4b   :  { %494 = vmatprep.subr.bf16.mxu0 %v609_v0 }
  0x4e   :  { %495 = vmatpush3.bf16.msra.mxu0 %v524_v55 }
 0x103   :  { %v108_v12 = vpop.f32.mrb[0].mxu0 }
 0x104   :  { %v114_v13 = vrot.slane %v108_v12, 4  ;;  %v458_v14 = vpop.f32.mrb[1].mxu0 }
 0x105   :  { %v111_v15 = vpop.f32.mrb[2].mxu0 }
 0x106   :  { %v115_v16 = vadd.f32 %v114_v13, %v108_v12  ;;  %v459_v17 = vpop.f32.mrb[3].mxu0  ;;  %v50_v13 = vld [vmem:[%s779_s4 + $0x2] sm:$0x1] }
 0x108   :  { %v116_v18 = vrot.slane %v115_v16, 2 }
 0x10a   :  { %v117_v19 = vadd.f32 %v116_v18, %v115_v16  ;;  %v51_v16 = vld [vmem:[%s779_s4 + $0x3] sm:$0x1] }
 0x10c   :  { %v118_v20 = vrot.slane %v117_v19, 1 }
 0x10e   :  { %v119_v21 = vadd.f32 %v118_v20, %v117_v19 }
 0x110   :  { %v121_v22 = vmul.f32 0.125, %v119_v21 }
 0x112   :  { %v122_v23 = vsub.f32 %v108_v12, %v121_v22 }
 0x114   :  { %v123_v24 = vmul.f32 %v122_v23, %v122_v23 }
 0x116   :  { %v124_v25 = vrot.slane %v123_v24, 4 }
 0x118   :  { %v125_v26 = vadd.f32 %v124_v25, %v123_v24  ;;  %v422_v25 = vld [vmem:[%s779_s4 + $0x4] ss:$0 sm:$0xff] }
 0x11a   :  { %v126_v27 = vrot.slane %v125_v26, 2 }
 0x11c   :  { %v127_v28 = vadd.f32 %v126_v27, %v125_v26 }
 0x11e   :  { %v128_v29 = vrot.slane %v127_v28, 1 }
 0x120   :  { %v129_v30 = vadd.f32 %v128_v29, %v127_v28 }
 0x122   :  { %v130_v31 = vmul.f32 0.125, %v129_v30 }
 0x124   :  { %v131_v32 = vadd.f32 1e-05, %v130_v31 }
 0x126   :  { %525 = vrsqrt.f32 %v131_v32 }
 0x130   :  { %v526_v37 = vpop.eup %525 }
 0x131   :  { %v133_v38 = vmul.f32 %v526_v37, %v48_v35 }
 0x133   :  { %v134_v40 = vmul.f32 %v133_v38, %v121_v22  ;;  %v139_v41 = vrot.slane %v133_v38, %v714_v36 }
 0x135   :  { %v135_v42 = vsub.f32 %v49_v39, %v134_v40  ;;  %v140_v43 = vmul.f32 %v139_v41, %v108_v12 }
 0x137   :  { %v144_v44 = vrot.slane %v135_v42, %v714_v36 }
 0x139   :  { %v145_v45 = vadd.f32 %v144_v44, %v140_v43 }
 0x13b   :  { %527 = vtanh.f32 %v145_v45 }
 0x145   :  { %v528_v46 = vpop.eup %527 }
 0x146   :  { %v147_v47 = vpack.c.bf16 %v528_v46, %v528_v46 }
 0x148   :  { %477 = vmatmul.mubr.bf16.vlgmr.msra.gmra.mrb[0].mxu1 %v147_v47 }
 0x21b   :  { %v246_v56 = vpop.f32.mrb[0].mxu1 }
 0x21c   :  { %v252_v57 = vrot.slane %v246_v56, 4  ;;  %v478_v58 = vpop.f32.mrb[1].mxu1 }
 0x21d   :  { %v249_v59 = vpop.f32.mrb[2].mxu1 }
 0x21e   :  { %v253_v60 = vadd.f32 %v252_v57, %v246_v56  ;;  %v479_v61 = vpop.f32.mrb[3].mxu1 }
 0x220   :  { %v254_v62 = vrot.slane %v253_v60, 2 }
 0x222   :  { %v255_v63 = vadd.f32 %v254_v62, %v253_v60 }
 0x224   :  { %v256_v1 = vrot.slane %v255_v63, 1 }
 0x226   :  { %v257_v2 = vadd.f32 %v256_v1, %v255_v63 }
 0x228   :  { %v258_v3 = vmul.f32 0.125, %v257_v2 }
 0x22a   :  { %v259_v4 = vsub.f32 %v246_v56, %v258_v3 }
 0x22c   :  { %v260_v5 = vmul.f32 %v259_v4, %v259_v4 }
 0x22e   :  { %v261_v6 = vrot.slane %v260_v5, 4 }
 0x230   :  { %v262_v7 = vadd.f32 %v261_v6, %v260_v5 }
 0x232   :  { %v263_v8 = vrot.slane %v262_v7, 2 }
 0x234   :  { %v264_v9 = vadd.f32 %v263_v8, %v262_v7 }
 0x236   :  { %v265_v10 = vrot.slane %v264_v9, 1 }
 0x238   :  { %v266_v0 = vadd.f32 %v265_v10, %v264_v9 }
 0x23a   :  { %v267_v11 = vmul.f32 0.125, %v266_v0 }
 0x23c   :  { %v268_v12 = vadd.f32 1e-05, %v267_v11 }
 0x23e   :  { %529 = vrsqrt.f32 %v268_v12 }
 0x248   :  { %v530_v14 = vpop.eup %529 }
 0x249   :  { %v270_v15 = vmul.f32 %v530_v14, %v50_v13 }
 0x24b   :  { %v271_v17 = vmul.f32 %v270_v15, %v258_v3  ;;  %v276_v18 = vrot.slane %v270_v15, %v714_v36 }
 0x24d   :  { %v272_v19 = vsub.f32 %v51_v16, %v271_v17  ;;  %v277_v20 = vmul.f32 %v276_v18, %v246_v56 }
 0x24f   :  { %v281_v21 = vrot.slane %v272_v19, %v714_v36 }
 0x251   :  { %v282_v22 = vadd.f32 %v281_v21, %v277_v20 }
 0x253   :  { %531 = vtanh.f32 %v282_v22 }
 0x25d   :  { %v532_v23 = vpop.eup %531 }
 0x25e   :  { %v284_v24 = vpack.c.bf16 %v532_v23, %v532_v23 }
 0x260   :  { %497 = vmatmul.mubr.bf16.vlgmr.msra.gmra.mrb[4].mxu0 %v284_v24 }
 0x333   :  { %v387_v26 = vpop.f32.mrb[4].mxu0 }
 0x334   :  { %v388_v27 = vadd.f32 %v422_v25, %v387_v26  ;;  %v498_v28 = vpop.f32.mrb[5].mxu0 }
 0x335   :  { %v390_v29 = vpop.f32.mrb[6].mxu0 }
 0x336   :  { %v499_v30 = vpop.f32.mrb[7].mxu0  ;;  %394 = vst.msk [vmem:[#allocation7] sm:$0xff] %vm393_vm2, %v388_v27 }
 0x337   :  { %588 = shalt.err (!%p585_p6)
}
 0x338   :  { %s589_s4 = scalar_lea.hbm %s780_s5, 128 }
 0x339   :  { %p590_p7 = scmp.ne.s32.totalorder %s780_s5, %s589_s4  ;;  %p593_p8 = scmp.lt.u32.totalorder %s589_s4, %s780_s5 }
 0x33b   :  { %p595_p9 = pnand %p593_p8, %p590_p7 }
 0x33d   :  { %598 = shalt.err (!%p595_p9)
}
 0x33e   :  { %404 = dma.vmem_to_hbm [thread:$0]  %s402_s6, 128, %s780_s5, [#allocation4]  }
 0x33f   :  { %603 = dma.done.wait [#allocation4], 128  }
 0x340   :  { %604 = vsyncadd [#allocation4], 4294967168 }
 0x341   :  { %408 = vsyncpa [#allocation3], 1 }
 0x342   :  { %409 = vsyncpa [#allocation6], 1 }
 0x343   :  { %410 = vsyncpa [#allocation4], 1 }

</bundles_post_ra>
